<compile_context>
chip_gen: v7x
topology: tpu7x:2x2x1
jax: 0.10.0
libtpu: 0.0.40
codegen_flags: <defaults>
</compile_context>

<pallas_src>
import jax
import jax.numpy as jnp
from jax import lax
from jax.experimental import pallas as pl
from jax.experimental.pallas import tpu as pltpu

LANE = 128


def moe_kernel(x_ref, w_ref, b_ref, out_ref, m_s, l_s, acc_s):
    # x_ref   [tb, F]        batch tile (resident across the expert axis)
    # w_ref   [F, Dp+128]    expert-e energy weights + gate column at lane Dp
    # b_ref   [1, Dp+128]    matching biases (f32)
    # out_ref [tb, Dp]       lane-dense padded output slab
    # m_s/l_s [tb, 1], acc_s [tb, Dp]  f32 online-softmax state
    e = pl.program_id(1)
    dp = acc_s.shape[-1]

    @pl.when(e == 0)
    def _init():
        m_s[...] = jnp.full(m_s.shape, -jnp.inf, m_s.dtype)
        l_s[...] = jnp.zeros(l_s.shape, l_s.dtype)
        acc_s[...] = jnp.zeros(acc_s.shape, acc_s.dtype)

    # One MXU matmul per expert step: energies AND this expert's gate logit.
    fused = jnp.dot(x_ref[...], w_ref[...],
                    preferred_element_type=jnp.float32) + b_ref[...]
    pred = fused[:, :dp]            # [tb, Dp]  tile-aligned slice
    logit = fused[:, dp:dp + 1]     # [tb, 1]   first lane of the gate tile

    # Online softmax over the expert axis (weighted sum accumulates on VPU).
    m_prev = m_s[...]
    m_new = jnp.maximum(m_prev, logit)
    alpha = jnp.exp(m_prev - m_new)
    p = jnp.exp(logit - m_new)
    l_s[...] = alpha * l_s[...] + p
    acc_s[...] = alpha * acc_s[...] + p * pred
    m_s[...] = m_new

    @pl.when(e == pl.num_programs(1) - 1)
    def _finalize():
        # Exact divide (gate weights sum to 1 exactly up to f32 rounding).
        out_ref[...] = (acc_s[...] / l_s[...]).astype(out_ref.dtype)


def pack_moe_params(expert_w, expert_b, gate_w, gate_b, *, dtype=jnp.bfloat16):
    """Pack once (hoisted out of the per-call path).

    expert_w [E, F, D], expert_b [E, D], gate_w [F, E], gate_b [E]
    -> w_pack [E, F, Dp+128] (dtype), b_pack [E, 1, Dp+128] (f32)
    Energy columns occupy lanes [0, D); lanes [D, Dp) are zero padding; the
    expert's gate column sits at lane Dp (its own 128-lane tile).
    """
    E, F, D = expert_w.shape
    dp = ((D + LANE - 1) // LANE) * LANE
    C = dp + LANE

    w_pack = jnp.zeros((E, F, C), jnp.float32)
    w_pack = w_pack.at[:, :, :D].set(expert_w)
    w_pack = w_pack.at[:, :, dp].set(jnp.transpose(gate_w))   # [E, F]

    b_pack = jnp.zeros((E, 1, C), jnp.float32)
    b_pack = b_pack.at[:, 0, :D].set(expert_b)
    b_pack = b_pack.at[:, 0, dp].set(gate_b)

    return w_pack.astype(dtype), b_pack   # bias stays f32 (VPU add)


def mixture_of_experts(data, w_pack, b_pack, out_dim, *, block_b=256):
    """data [B, F] + packed params -> prediction [B, out_dim]."""
    B, F = data.shape
    E, _, C = w_pack.shape
    dp = C - LANE

    tb = min(block_b, B)            # 256 on v6e/v7x; use block_b=128 on v5e
    nb = pl.cdiv(B, tb)             # >=2 blocks lets v7x shard across its 2 TCs

    cost = pl.CostEstimate(
        flops=2 * B * F * E * C,
        transcendentals=2 * B * E,
        bytes_accessed=(data.size * data.dtype.itemsize
                        + w_pack.size * w_pack.dtype.itemsize
                        + b_pack.size * b_pack.dtype.itemsize
                        + B * dp * 4),
    )

    out = pl.pallas_call(
        moe_kernel,
        out_shape=jax.ShapeDtypeStruct((B, dp), jnp.float32),
        grid_spec=pltpu.PrefetchScalarGridSpec(
            num_scalar_prefetch=0,
            grid=(nb, E),                                   # reduction axis last
            in_specs=[
                pl.BlockSpec((tb, F), lambda i, e: (i, 0)),        # data tile
                pl.BlockSpec((None, F, C), lambda i, e: (e, 0, 0)),  # expert e weights
                pl.BlockSpec((None, 1, C), lambda i, e: (e, 0, 0)),  # expert e biases
            ],
            out_specs=pl.BlockSpec((tb, dp), lambda i, e: (i, 0)),
            scratch_shapes=[
                pltpu.VMEM((tb, 1), jnp.float32),    # running max
                pltpu.VMEM((tb, 1), jnp.float32),    # running denom
                pltpu.VMEM((tb, dp), jnp.float32),   # weighted-sum accumulator
            ],
        ),
        compiler_params=pltpu.CompilerParams(
            dimension_semantics=("parallel", "arbitrary")),
        cost_estimate=cost,
    )(data.astype(w_pack.dtype), w_pack, b_pack)

    return out[:, :out_dim]


def moe_reference(data, expert_w, expert_b, gate_w, gate_b):
    # Pure-JAX reference mirroring the PyTorch forward (high precision).
    preds = jnp.einsum("bf,efd->bed", data, expert_w,
                       precision=lax.Precision.HIGHEST) + expert_b[None]
    logits = jnp.dot(data, gate_w, precision=lax.Precision.HIGHEST) + gate_b
    gate = jax.nn.softmax(logits, axis=-1)[:, :, None]
    return jnp.sum(preds * gate, axis=1)


if __name__ == "__main__":
    B, F, D, E = 8, 32, 16, 4   # batch, input features, energy dim, num experts

    key = jax.random.PRNGKey(0)
    k_x, k_we, k_be, k_wg, k_bg = jax.random.split(key, 5)

    data = jax.random.normal(k_x, (B, F), dtype=jnp.float32)
    expert_w = jax.random.normal(k_we, (E, F, D), dtype=jnp.float32) * 0.1
    expert_b = jax.random.normal(k_be, (E, D), dtype=jnp.float32) * 0.1
    gate_w = jax.random.normal(k_wg, (F, E), dtype=jnp.float32) * 0.1
    gate_b = jax.random.normal(k_bg, (E,), dtype=jnp.float32) * 0.1

    # ---- f32-operand run: bit-level parity check against the reference -----
    w32, b32 = pack_moe_params(expert_w, expert_b, gate_w, gate_b,
                               dtype=jnp.float32)
    out32 = jax.block_until_ready(mixture_of_experts(data, w32, b32, D))
    ref32 = moe_reference(data, expert_w, expert_b, gate_w, gate_b)
    assert out32.shape == (B, D)
    assert jnp.allclose(out32, ref32, atol=1e-4, rtol=1e-4), "f32 mismatch"

    # ---- bf16 MXU-operand run (production path), checked against a reference
    # ---- computed from the same bf16-rounded operands -----------------------
    w16, b16 = pack_moe_params(expert_w, expert_b, gate_w, gate_b,
                               dtype=jnp.bfloat16)
    out16 = jax.block_until_ready(mixture_of_experts(data, w16, b16, D))
    rd = lambda a: a.astype(jnp.bfloat16).astype(jnp.float32)
    ref16 = moe_reference(rd(data), rd(expert_w), expert_b, rd(gate_w), gate_b)
    assert out16.shape == (B, D)
    assert jnp.allclose(out16, ref16, atol=5e-3, rtol=5e-3), "bf16 mismatch"

    print("KERNEL_OK")
</pallas_src>

<mosaic_0001>
module attributes {stable_mosaic.version = 11 : i64} {
  func.func @moe_kernel(%arg0: i32, %arg1: i32, %arg2: memref<8x32xf32, #tpu.memory_space<vmem>>, %arg3: memref<1x32x256xf32, #tpu.memory_space<vmem>>, %arg4: memref<1x1x256xf32, #tpu.memory_space<vmem>>, %arg5: memref<8x128xf32, #tpu.memory_space<vmem>>, %arg6: memref<8x1xf32, #tpu.memory_space<vmem>>, %arg7: memref<8x1xf32, #tpu.memory_space<vmem>>, %arg8: memref<8x128xf32, #tpu.memory_space<vmem>>) attributes {dimension_semantics = [#tpu.dimension_semantics<parallel>, #tpu.dimension_semantics<arbitrary>], iteration_bounds = array<i64: 1, 4>, scalar_prefetch = 0 : i64, scratch_operands = 3 : i64, tpu.core_type = #tpu.core_type<tc>, window_params = [{transform_indices = @transform_0, window_bounds = array<i64: 8, 32>}, {transform_indices = @transform_1, window_bounds = array<i64: 1, 32, 256>}, {transform_indices = @transform_2, window_bounds = array<i64: 1, 1, 256>}, {transform_indices = @transform_3, window_bounds = array<i64: 8, 128>}]} {
    %c0_i32 = arith.constant 0 : i32
    %0 = arith.cmpi eq, %arg1, %c0_i32 : i32
    %1 = arith.extui %0 : i1 to i32
    %c0_i32_0 = arith.constant 0 : i32
    %2 = arith.cmpi ne, %1, %c0_i32_0 : i32
    scf.if %2 {
      %cst_21 = arith.constant 0xFF800000 : f32
      %34 = vector.broadcast %cst_21 : f32 to vector<8x1xf32>
      %c0_22 = arith.constant 0 : index
      %c0_23 = arith.constant 0 : index
      %35 = vector.load %arg6[%c0_22, %c0_23] : memref<8x1xf32, #tpu.memory_space<vmem>>, vector<8x1xf32>
      tpu.vector_store %arg6[%c0_22, %c0_23], %34 {strides = array<i32>} : memref<8x1xf32, #tpu.memory_space<vmem>>, vector<8x1xf32>,
      %cst_24 = arith.constant 0.000000e+00 : f32
      %36 = vector.broadcast %cst_24 : f32 to vector<8x1xf32>
      %c0_25 = arith.constant 0 : index
      %c0_26 = arith.constant 0 : index
      %37 = vector.load %arg7[%c0_25, %c0_26] : memref<8x1xf32, #tpu.memory_space<vmem>>, vector<8x1xf32>
      tpu.vector_store %arg7[%c0_25, %c0_26], %36 {strides = array<i32>} : memref<8x1xf32, #tpu.memory_space<vmem>>, vector<8x1xf32>,
      %cst_27 = arith.constant 0.000000e+00 : f32
      %38 = vector.broadcast %cst_27 : f32 to vector<8x128xf32>
      %c0_28 = arith.constant 0 : index
      %c0_29 = arith.constant 0 : index
      %39 = vector.load %arg8[%c0_28, %c0_29] : memref<8x128xf32, #tpu.memory_space<vmem>>, vector<8x128xf32>
      tpu.vector_store %arg8[%c0_28, %c0_29], %38 {strides = array<i32>} : memref<8x128xf32, #tpu.memory_space<vmem>>, vector<8x128xf32>,
    } else {
    }
    %c0 = arith.constant 0 : index
    %c0_1 = arith.constant 0 : index
    %3 = vector.load %arg2[%c0, %c0_1] : memref<8x32xf32, #tpu.memory_space<vmem>>, vector<8x32xf32>
    %c0_2 = arith.constant 0 : index
    %c0_3 = arith.constant 0 : index
    %c0_4 = arith.constant 0 : index
    %4 = vector.load %arg3[%c0_2, %c0_3, %c0_4] : memref<1x32x256xf32, #tpu.memory_space<vmem>>, vector<1x32x256xf32>
    %5 = vector.shape_cast %4 : vector<1x32x256xf32> to vector<32x256xf32>
    %cst = arith.constant dense<0.000000e+00> : vector<8x256xf32>
    %6 = tpu.matmul %3, %5, %cst {dimension_numbers = #tpu.dot_dimension_numbers<[1], [0], [0], [1], [0, 0, 1, 1], [], []>} : vector<8x32xf32>, vector<32x256xf32>, vector<8x256xf32> -> vector<8x256xf32>
    %c0_5 = arith.constant 0 : index
    %c0_6 = arith.constant 0 : index
    %c0_7 = arith.constant 0 : index
    %7 = vector.load %arg4[%c0_5, %c0_6, %c0_7] : memref<1x1x256xf32, #tpu.memory_space<vmem>>, vector<1x1x256xf32>
    %8 = vector.shape_cast %7 : vector<1x1x256xf32> to vector<1x256xf32>
    %9 = vector.broadcast %8 : vector<1x256xf32> to vector<8x256xf32>
    %10 = arith.addf %6, %9 : vector<8x256xf32>
    %11 = vector.extract_strided_slice %10 {offsets = [0, 0], sizes = [8, 128], strides = [1, 1]} : vector<8x256xf32> to vector<8x128xf32>
    %12 = vector.extract_strided_slice %10 {offsets = [0, 128], sizes = [8, 1], strides = [1, 1]} : vector<8x256xf32> to vector<8x1xf32>
    %c0_8 = arith.constant 0 : index
    %c0_9 = arith.constant 0 : index
    %13 = vector.load %arg6[%c0_8, %c0_9] : memref<8x1xf32, #tpu.memory_space<vmem>>, vector<8x1xf32>
    %14 = arith.maximumf %13, %12 : vector<8x1xf32>
    %15 = arith.subf %13, %14 : vector<8x1xf32>
    %16 = math.exp %15 : vector<8x1xf32>
    %17 = arith.subf %12, %14 : vector<8x1xf32>
    %18 = math.exp %17 : vector<8x1xf32>
    %c0_10 = arith.constant 0 : index
    %c0_11 = arith.constant 0 : index
    %19 = vector.load %arg7[%c0_10, %c0_11] : memref<8x1xf32, #tpu.memory_space<vmem>>, vector<8x1xf32>
    %20 = arith.mulf %16, %19 : vector<8x1xf32>
    %21 = arith.addf %20, %18 : vector<8x1xf32>
    %c0_12 = arith.constant 0 : index
    %c0_13 = arith.constant 0 : index
    %22 = vector.load %arg7[%c0_12, %c0_13] : memref<8x1xf32, #tpu.memory_space<vmem>>, vector<8x1xf32>
    tpu.vector_store %arg7[%c0_12, %c0_13], %21 {strides = array<i32>} : memref<8x1xf32, #tpu.memory_space<vmem>>, vector<8x1xf32>,
    %c0_14 = arith.constant 0 : index
    %c0_15 = arith.constant 0 : index
    %23 = vector.load %arg8[%c0_14, %c0_15] : memref<8x128xf32, #tpu.memory_space<vmem>>, vector<8x128xf32>
    %24 = vector.broadcast %16 : vector<8x1xf32> to vector<8x128xf32>
    %25 = arith.mulf %24, %23 : vector<8x128xf32>
    %26 = vector.broadcast %18 : vector<8x1xf32> to vector<8x128xf32>
    %27 = arith.mulf %26, %11 : vector<8x128xf32>
    %28 = arith.addf %25, %27 : vector<8x128xf32>
    %c0_16 = arith.constant 0 : index
    %c0_17 = arith.constant 0 : index
    %29 = vector.load %arg8[%c0_16, %c0_17] : memref<8x128xf32, #tpu.memory_space<vmem>>, vector<8x128xf32>
    tpu.vector_store %arg8[%c0_16, %c0_17], %28 {strides = array<i32>} : memref<8x128xf32, #tpu.memory_space<vmem>>, vector<8x128xf32>,
    %c0_18 = arith.constant 0 : index
    %c0_19 = arith.constant 0 : index
    %30 = vector.load %arg6[%c0_18, %c0_19] : memref<8x1xf32, #tpu.memory_space<vmem>>, vector<8x1xf32>
    tpu.vector_store %arg6[%c0_18, %c0_19], %14 {strides = array<i32>} : memref<8x1xf32, #tpu.memory_space<vmem>>, vector<8x1xf32>,
    %c3_i32 = arith.constant 3 : i32
    %31 = arith.cmpi eq, %arg1, %c3_i32 : i32
    %32 = arith.extui %31 : i1 to i32
    %c0_i32_20 = arith.constant 0 : i32
    %33 = arith.cmpi ne, %32, %c0_i32_20 : i32
    scf.if %33 {
      %c0_21 = arith.constant 0 : index
      %c0_22 = arith.constant 0 : index
      %34 = vector.load %arg8[%c0_21, %c0_22] : memref<8x128xf32, #tpu.memory_space<vmem>>, vector<8x128xf32>
      %c0_23 = arith.constant 0 : index
      %c0_24 = arith.constant 0 : index
      %35 = vector.load %arg7[%c0_23, %c0_24] : memref<8x1xf32, #tpu.memory_space<vmem>>, vector<8x1xf32>
      %36 = vector.broadcast %35 : vector<8x1xf32> to vector<8x128xf32>
      %37 = arith.divf %34, %36 : vector<8x128xf32>
      %c0_25 = arith.constant 0 : index
      %c0_26 = arith.constant 0 : index
      %38 = vector.load %arg5[%c0_25, %c0_26] : memref<8x128xf32, #tpu.memory_space<vmem>>, vector<8x128xf32>
      tpu.vector_store %arg5[%c0_25, %c0_26], %37 {strides = array<i32>} : memref<8x128xf32, #tpu.memory_space<vmem>>, vector<8x128xf32>,
    } else {
    }
    return
  }
  func.func @transform_0(%arg0: i32, %arg1: i32) -> (i32, i32) {
    %c0_i32 = arith.constant 0 : i32
    %c0_i32_0 = arith.constant 0 : i32
    return %arg0, %c0_i32 : i32, i32
  }
  func.func @transform_1(%arg0: i32, %arg1: i32) -> (i32, i32, i32) {
    %c0_i32 = arith.constant 0 : i32
    %c0_i32_0 = arith.constant 0 : i32
    %c0_i32_1 = arith.constant 0 : i32
    return %arg1, %c0_i32, %c0_i32_0 : i32, i32, i32
  }
  func.func @transform_2(%arg0: i32, %arg1: i32) -> (i32, i32, i32) {
    %c0_i32 = arith.constant 0 : i32
    %c0_i32_0 = arith.constant 0 : i32
    %c0_i32_1 = arith.constant 0 : i32
    return %arg1, %c0_i32, %c0_i32_0 : i32, i32, i32
  }
  func.func @transform_3(%arg0: i32, %arg1: i32) -> (i32, i32) {
    %c0_i32 = arith.constant 0 : i32
    %c0_i32_0 = arith.constant 0 : i32
    return %arg0, %c0_i32 : i32, i32
  }
}

</mosaic_0001>

<bundles_post_ra>
// kernel: tpu_custom_call.1
= control target key start
LH: loop header
LB: loop body
LE: loop exit
PB: predicated region body
PF: predicated region fallthrough
CT: control target
= control target key end

     0   :  { %8 = vsyncpa [#allocation6], 0  ;;  %s1052_s0 = inlined_call_operand.hbm [shape: f32[8,32], index: 0, kind: input, shape index: {}]   ;;  %s1053_s1 = inlined_call_operand.hbm [shape: f32[4,32,256], index: 1, kind: input, shape index: {}]   ;;  %s1054_s2 = inlined_call_operand.hbm [shape: f32[4,1,256], index: 2, kind: input, shape index: {}]   ;;  %s1055_s3 = inlined_call_operand.hbm [shape: f32[8,128], index: 3, kind: output, shape index: {}]  }
   0x1   :  { %9 = vsyncpa [#allocation9], 0 }
   0x2   :  { %11 = vsyncpa [#allocation9 + $0x1], 0 }
   0x3   :  { %12 = vsyncpa [#allocation7], 0  ;;  %s829_s12 = smov 0   ;;  %s831_s13 = smov 0  }
   0x4   :  { %s833_s14 = smov 0   ;;  %s835_s15 = smov 0  }
   0x5   :  { %s837_s16 = smov 0   ;;  %s839_s17 = smov 0  }
   0x6 LB: > { %s27_s18 = sadd.s32 1, %s792_s16  ;;  %s63_s19 = sadd.s32 1, %s784_s14  ;;  %s796_s17 = sphi %s839_s17, %s18_s17   ;;  %s792_s16 = sphi %s837_s16, %s1077_s16   ;;  %s788_s15 = sphi %s835_s15, %s1076_s15   ;;  %s784_s14 = sphi %s833_s14, %s1075_s14   ;;  %s780_s13 = sphi %s831_s13, %s1074_s13   ;;  %s776_s12 = sphi %s829_s12, %s1073_s12  }
   0x7   : > { %p28_p0 = scmp.ge.s32.totalorder %s27_s18, 4  ;;  %p70_p1 = scmp.ne.s32.totalorder %s784_s14, %s780_s13 }
   0x8   : > { %p71_p2 = scmp.eq.s32.totalorder %s796_s17, 0  ;;  %p555_p4 = scmp.lt.s32.totalorder %s796_s17, 4 }
   0x9   : > { %s1079_s18 = smov (%p28_p0, %s27_s18), 0  ;;  %s165_s21 = sand.u32 1, %s796_s17  }
   0xa   : > { %p72_p3 = por %p71_p2, %p70_p1  ;;  %s60_s20 = ssub.s32 %s792_s16, %s1079_s18 }
   0xb   : > { %p61_p5 = scmp.eq.s32.totalorder %s60_s20, 0  ;;  %s167_s22 = sand.u32 1, %s784_s14  }
   0xc   : > { %s521_s23 = sshll.u32 %s792_s16, 10  ;;  %s504_s25 = sshll.u32 %s167_s22, 6 }
   0xd   : > { %s873_s24 = scalar_select %p61_p5, %s784_s14, %s63_s19  }
   0xe   : > { %s880_s28 = scalar_lea.hbm %s1053_s1, %s521_s23  ;;  %p882_p6 = pnand %p555_p4, %p72_p3 }
   0xf   : > { %s169_s30 = scalar_lea.vmem [#allocation8], %s504_s25  ;;  %s888_s5 = scalar_lea.sflag [#allocation9], %s165_s21 }
  0x10   : > { %s1062_s29 = scalar_select %p882_p6, 1, 0 }
  0x11   : > { %s176_s4 = sshll.u32 %s169_s30, 4  ;;  %s624_s6 = scalar_lea.hbm %s880_s28, 1024  ;;  %s886_s4 = int_to_ptr.vmem [resolvable:$true] %s176_s4 }
  0x12   : > { %p625_p7 = scmp.ne.s32.totalorder %s880_s28, %s624_s6  ;;  %p1057_p8 = pneg %p882_p6 }
  0x13   : > { %s629_s9 = scalar_lea.hbm %s1053_s1, 4096  ;;  %p630_p11 = scmp.lt.u32.totalorder %s880_s28, %s1053_s1 }
  0x14   : > { %p627_p9 = pnand %p1057_p8, %p625_p7  ;;  %p631_p12 = scmp.lt.u32.totalorder %s629_s9, %s624_s6 }
  0x15   : > { %p633_p0 = scmp.lt.u32.totalorder %s624_s6, %s880_s28 }
  0x16   : > { %p628_p10 = pneg %p627_p9  ;;  %p632_p13 = por %p631_p12, %p630_p11 }
  0x18   : > { %p634_p1 = por %p633_p0, %p632_p13 }
  0x1a   : > { %p635_p2 = pnand %p634_p1, %p628_p10 }
  0x1c   : > { %638 = shalt.err (!%p635_p2)
}
  0x1d   : > { %s639_s19 = scalar_lea.vmem %s886_s4, 1024  ;;  %s798_s20 = smov [#allocation8]  }
  0x1e   : > { %p640_p3 = scmp.ne.s32.totalorder %s886_s4, %s639_s19  ;;  %s644_s21 = sshll.u32 %s798_s20, 4  ;;  %s645_s21 = int_to_ptr.vmem [resolvable:$false] %s644_s21 }
  0x1f   : > { %s646_s23 = scalar_lea.vmem %s645_s21, 2048  ;;  %p647_p7 = scmp.lt.s32.totalorder %s886_s4, %s645_s21 }
  0x20   : > { %p642_p4 = pnand %p640_p3, %p1057_p8  ;;  %p648_p9 = scmp.lt.s32.totalorder %s646_s23, %s639_s19 }
  0x22   : > { %p643_p5 = pneg %p642_p4  ;;  %p649_p11 = por %p648_p9, %p647_p7 }
  0x24   : > { %p650_p12 = pnand %p649_p11, %p643_p5 }
  0x26   : > { %653 = shalt.err (!%p650_p12)
}
  0x27   : > { %s799_s25 = smov 256   ;;  %s800_s26 = smov 16  }
  0x28   : > { %550 = dma.hbm_to_vmem [thread:$0]  (!%p882_p6), %s880_s28, 1024, %s886_s4, %s888_s5, %s799_s25, %s799_s25, %s800_s26  }
  0x29   : > { %s917_s27 = sadd.s32 4294967295, %s796_s17   ;;  %p76_p10 = scmp.ne.s32.totalorder %s780_s13, %s776_s12 }
  0x2a   : > { %p1056_p13 = scmp.eq.s32.totalorder %s917_s27, 0  ;;  %p501_p0 = scmp.ge.s32.totalorder %s796_s17, 1 }
  0x2b   : > { %p139_p1 = scmp.lt.s32.totalorder %s796_s17, 5  ;;  %s801_s28 = smov [#allocation5]  }
  0x2c   : > { %p926_p2 = por %p1056_p13, %p76_p10  ;;  %s154_s4 = sshll.u32 %s801_s28, 4  ;;  %s155_s4 = int_to_ptr.vmem [resolvable:$true] %s154_s4 }
  0x2d   : > { %p930_p3 = pnand %p501_p0, %p139_p1  ;;  %s507_s7 = sshll.u32 %s167_s22, 1 }
  0x2e   : > { %s1063_s30 = scalar_select %p926_p2, 1, 0 }
  0x2f   : > { %s1064_s6 = scalar_select %p930_p3, 1, 0 }
  0x30   : > { %p543_p4 = pneg %p930_p3  ;;  %s522_s12 = sshll.u32 %s792_s16, 5 }
  0x31   : > { %s948_s11 = scalar_lea.hbm %s1054_s2, %s522_s12  ;;  %s190_s19 = scalar_lea.vmem [#allocation10], %s507_s7 }
  0x32   : > { %p941_p5 = pnand %p543_p4, %p1056_p13  ;;  %s198_s20 = sshll.u32 %s190_s19, 4  ;;  %s950_s20 = int_to_ptr.vmem [resolvable:$true] %s198_s20 }
  0x33   : > { %s654_s23 = scalar_lea.hbm %s1052_s0, 128 }
  0x34   : > { %p655_p7 = scmp.ne.s32.totalorder %s1052_s0, %s654_s23  ;;  %p656_p9 = pneg %p941_p5 }
  0x35   : > { %p661_p10 = scmp.lt.u32.totalorder %s654_s23, %s1052_s0 }
  0x36   : > { %p657_p11 = pnand %p656_p9, %p655_p7 }
  0x38   : > { %p658_p12 = pneg %p657_p11 }
  0x3a   : > { %p663_p0 = pnand %p661_p10, %p658_p12 }
  0x3c   : > { %666 = shalt.err (!%p663_p0)
}
  0x3d   : > { %s667_s7 = scalar_lea.vmem %s155_s4, 128  ;;  %p675_p8 = scmp.lt.s32.totalorder %s155_s4, %s155_s4 }
  0x3e   : > { %p668_p1 = scmp.ne.s32.totalorder %s155_s4, %s667_s7  ;;  %p676_p2 = scmp.lt.s32.totalorder %s667_s7, %s667_s7 }
  0x40   : > { %p670_p4 = pnand %p668_p1, %p656_p9  ;;  %p677_p3 = por %p676_p2, %p675_p8 }
  0x42   : > { %p671_p13 = pneg %p670_p4 }
  0x44   : > { %p678_p6 = pnand %p677_p3, %p671_p13 }
  0x46   : > { %681 = shalt.err (!%p678_p6)
}
  0x47   : > { %546 = dma.hbm_to_vmem [thread:$0]  (!%p941_p5), %s1052_s0, 128, %s155_s4, [#allocation6]  }
  0x48   : > { %s682_s19 = scalar_lea.hbm %s948_s11, 32  ;;  %p1066_p9 = scmp.ne.s32.totalorder %s1062_s29, 0 }
  0x49   : > { %p683_p7 = scmp.ne.s32.totalorder %s948_s11, %s682_s19  ;;  %s687_s23 = scalar_lea.hbm %s1054_s2, 128 }
  0x4a   : > { %p1067_p11 = pneg %p1066_p9  ;;  %p688_p6 = scmp.lt.u32.totalorder %s948_s11, %s1054_s2 }
  0x4b   : > { %p689_p8 = scmp.lt.u32.totalorder %s687_s23, %s682_s19  ;;  %p691_p2 = scmp.lt.u32.totalorder %s682_s19, %s948_s11 }
  0x4c   : > { %p685_p12 = pnand %p683_p7, %p1067_p11 }
  0x4d   : > { %p690_p13 = por %p689_p8, %p688_p6 }
  0x4e   : > { %p686_p10 = pneg %p685_p12 }
  0x4f   : > { %p692_p3 = por %p691_p2, %p690_p13 }
  0x51   : > { %p693_p0 = pnand %p692_p3, %p686_p10 }
  0x53   : > { %696 = shalt.err (!%p693_p0)
}
  0x54   : > { %s697_s4 = scalar_lea.vmem %s950_s20, 32  ;;  %p1068_p1 = pmov %p1067_p11 }
  0x55   : > { %p698_p5 = scmp.ne.s32.totalorder %s950_s20, %s697_s4  ;;  %s802_s26 = smov [#allocation10]  }
  0x56   : > { %s702_s28 = sshll.u32 %s802_s26, 4  ;;  %s703_s28 = int_to_ptr.vmem [resolvable:$false] %s702_s28 }
  0x57   : > { %p700_p4 = pnand %p698_p5, %p1068_p1  ;;  %s704_s9 = scalar_lea.vmem %s703_s28, 64 }
  0x58   : > { %p705_p11 = scmp.lt.s32.totalorder %s950_s20, %s703_s28  ;;  %p706_p12 = scmp.lt.s32.totalorder %s704_s9, %s697_s4 }
  0x59   : > { %p701_p7 = pneg %p700_p4 }
  0x5a   : > { %p707_p6 = por %p706_p12, %p705_p11 }
  0x5c   : > { %p708_p8 = pnand %p707_p6, %p701_p7 }
  0x5e   : > { %711 = shalt.err (!%p708_p8)
}
  0x5f   : > { %553 = dma.hbm_to_vmem [thread:$0]  (!%p1066_p9), %s948_s11, 32, %s950_s20, %s888_s5  }
  0x60   : > { %p1069_p10 = scmp.ne.s32.totalorder %s1064_s6, 0 }
  0x61   : > { %p1070_p13 = scmp.eq.s32.totalorder (!%p1069_p10), %s917_s27, 0 }
  0x62   : > { %207 = sbr.rel (%p1069_p10) target bundleno = 542 (0x21e), region = 32 }
  0x69   : > { %763 = dma.done.wait (%p1070_p13), [#allocation6], 128   ;;  %p1071_p2 = pmov %p1070_p13 }
  0x6a   : > { %s213_s7 = sand.u32 1, %s917_s27   ;;  %s215_s12 = sand.u32 1, %s780_s13  }
  0x6b   : > { %765 = vsyncadd (%p1071_p2), [#allocation6], 4294967168  ;;  %s512_s10 = sshll.u32 %s215_s12, 6  ;;  %s214_s29 = scalar_lea.sflag [#allocation9], %s213_s7 }
  0x6c   : > { %s217_s19 = scalar_lea.vmem [#allocation8], %s512_s10  ;;  %p1072_p3 = scmp.ne.s32.totalorder %s1063_s30, 0 }
  0x6e   : > { %767 = dma.done.wait (%p1072_p3), %s214_s29, 1056  }
  0x6f   : > { %769 = vsyncadd (%p1072_p3), %s214_s29, 4294966240  ;;  %s1004_s5 = sshll.u32 %s215_s12, 1  ;;  %p514_p9 = scmp.ne.s32.totalorder %s788_s15, 0 }
  0x70   : > { %s226_s6 = scalar_lea.vmem [#allocation10], %s1004_s5  ;;  %vm253_vm0 = vcmask (!%p514_p9), 7168   ;;  %v803_v0 = vmov (!%p514_p9), -inf   ;;  %v804_v1 = vmov (!%p514_p9), 0.0  }
  0x71   : > { %252 = sbr.rel (%p514_p9) target bundleno = 120 (0x78), region = 48  ;;  %254 = vst.msk [vmem:[#allocation2] sm:$0xff] (!%p514_p9), %vm253_vm0, %v803_v0  ;;  %255 = vst.msk [vmem:[#allocation3] sm:$0xff] (!%p514_p9), %vm253_vm0, %v804_v1 }
  0x72   : > { %256 = vst [vmem:[#allocation4] sm:$0xff] (!%p514_p9), %v804_v1 }
  0x78 PF: > { %v259_v2 = vld [vmem:[%s217_s19 + $0x8] sm:$0xff]  ;;  %v261_v3 = vld [vmem:[%s217_s19 + $0x18] sm:$0xff]  ;;  %v258_v4 = vld [vmem:[%s217_s19] sm:$0xff]  ;;  %v805_v9 = vmov 0.0   ;;  %vm278_vm1 = vcmask 261120   ;;  %v806_v16 = vmov 0   ;;  %v268_v17 = vlaneseq }
  0x79   : > { %v523_v5 = vpack.c.bf16 %v261_v3, %v259_v2  ;;  %v260_v6 = vld [vmem:[%s217_s19 + $0x10] sm:$0xff]  ;;  %v263_v7 = vld [vmem:[%s217_s19 + $0x28] sm:$0xff]  ;;  %v265_v8 = vld [vmem:[%s217_s19 + $0x38] sm:$0xff]  ;;  %346 = vmatprep.mubr.f32.mxu0 %v805_v9  ;;  %616 = vset.pattern.permute.xlu0 %v806_v16  ;;  %vm364_vm2 = vcmask 7168   ;;  %p516_p0 = scmp.ne.s32.totalorder %s788_s15, 3 }
  0x7a   : > { %v525_v10 = vpack.c.bf16 %v260_v6, %v258_v4  ;;  %v527_v11 = vpack.c.bf16 %v265_v8, %v263_v7  ;;  %v262_v12 = vld [vmem:[%s217_s19 + $0x20] sm:$0xff]  ;;  %v264_v13 = vld [vmem:[%s217_s19 + $0x30] sm:$0xff]  ;;  %v257_v15 = vld [vmem:[#allocation5] sm:$0xff]  ;;  %v269_v18 = vshrl.u32 %v268_v17, 7  ;;  %v807_v46 = vmov (!%p516_p0), 0  }
  0x7b   : > { %524 = vmatprep.subr.bf16.mxu0 %v523_v5  ;;  %v529_v14 = vpack.c.bf16 %v264_v13, %v262_v12  ;;  %v266_v20 = vld [vmem:[%s226_s6] sm:$0x3]  ;;  %v361_v31 = vld [vmem:[#allocation3] sm:$0xff]  ;;  %v366_v39 = vld [vmem:[#allocation4] sm:$0xff] }
  0x7c   : > { %526 = vmatpush1.bf16.msra.mxu0 %v525_v10  ;;  %v274_v19 = vsub.s32 1, %v269_v18  ;;  %v353_v24 = vld [vmem:[#allocation2] sm:$0xff]  ;;  %v270_v36 = vsub.s32 0, %v269_v18 }
  0x7d   : > { %528 = vmatprep.subr.bf16.mxu0 %v527_v11 }
  0x7e   : > { %v275_v21 = vrot.slane %v266_v20, %v274_v19  ;;  %v271_v37 = vrot.slane %v266_v20, %v270_v36 }
  0x80   : > { %530 = vmatpush1.bf16.msra.mxu0 %v529_v14 }
  0x83   : > { %515 = vmatmul.mubr.msk.f32.vlgmr.msra.gmra.mrb[0].mxu0 %vm278_vm1, %v257_v15 }
 0x156   : > { %v348_v22 = vpop.f32.mrb[0].mxu0 }
 0x157   : > { %v350_v23 = vpop.f32.mrb[1].mxu0  ;;  %v349_v40 = vadd.f32 %v348_v22, %v271_v37 }
 0x158   : > { %v351_v25 = vadd.f32 %v350_v23, %v275_v21 }
 0x15a   : > { %v354_v26 = vmax.f32 %v353_v24, %v351_v25 }
 0x15c   : > { %v355_v27 = vsub.f32 %v353_v24, %v354_v26  ;;  %v358_v28 = vsub.f32 %v351_v25, %v354_v26  ;;  %381 = vst.msk [vmem:[#allocation2] sm:$0xff] %vm364_vm2, %v354_v26 }
 0x15e   : > { %v356_v29 = vmul.f32 1.442695, %v355_v27  ;;  %v359_v30 = vmul.f32 1.442695, %v358_v28 }
 0x160   : > { %617 = vpow2.f32 %v356_v29 }
 0x161   : > { %619 = vpow2.f32 %v359_v30 }
 0x16a   : > { %v618_v32 = vpop.eup %617 }
 0x16b   : > { %v362_v33 = vmul.f32 %v618_v32, %v361_v31  ;;  %369 = vperm.xlu0 %616, %v618_v32   ;;  %v620_v34 = vpop.eup %619 }
 0x16d   : > { %v363_v35 = vadd.f32 %v620_v34, %v362_v33 }
 0x16f   : > { %365 = vst.msk [vmem:[#allocation3] sm:$0xff] %vm364_vm2, %v363_v35  ;;  %375 = vperm.xlu0 %616, %v620_v34  }
 0x173   : > { %621 = vset.pattern.permute.xlu0 (!%p516_p0), %v807_v46 }
 0x176   : > { %v387_v45 = vld [vmem:[#allocation3] sm:$0xff] (!%p516_p0) }
 0x177   : > { %390 = vperm.xlu0 (!%p516_p0), %621, %v387_v45  }
 0x1ea   : > { %v370_v38 = vpop.permute.xlu0 %369 }
 0x1eb   : > { %v372_v42 = vmul.f32 %v370_v38, %v366_v39 }
 0x1ed   : > { %385 = sbr.rel (%p516_p0) target bundleno = 517 (0x205), region = 52 }
 0x1ee   : > { %v376_v41 = vpop.permute.xlu0 %375 }
 0x1ef   : > { %v378_v43 = vmul.f32 %v376_v41, %v349_v40 }
 0x1f1   : > { %v379_v44 = vadd.f32 %v378_v43, %v372_v42 }
 0x1f3   : > { %380 = vst [vmem:[#allocation4] sm:$0xff] %v379_v44 }
 0x1f6   : > { %v391_v47 = vpop.permute.xlu0 %390 }
 0x1f7   : > { %622 = vrcp.f32 %v391_v47 }
 0x1fa   : > { %v386_v48 = vld [vmem:[#allocation4] sm:$0xff] }
 0x201   : > { %v623_v49 = vpop.eup %622 }
 0x202   : > { %v394_v50 = vmul.f32 %v623_v49, %v386_v48 }
 0x204   : > { %395 = vst [vmem:[#allocation11] sm:$0xff] %v394_v50 }
 0x205 PF: > { %p557_p5 = scmp.eq.s32.totalorder %s917_s27, 3  ;;  %s808_s30 = smov [#allocation11]  }
 0x206   : > { %s405_s11 = sshll.u32 %s808_s30, 4  ;;  %s406_s11 = int_to_ptr.vmem [resolvable:$true] %s405_s11 }
 0x207   : > { %s712_s20 = scalar_lea.vmem %s406_s11, 128  ;;  %p719_p11 = scmp.lt.s32.totalorder %s406_s11, %s406_s11 }
 0x208   : > { %p713_p1 = scmp.ne.s32.totalorder %s406_s11, %s712_s20  ;;  %p720_p12 = scmp.lt.s32.totalorder %s712_s20, %s712_s20 }
 0x20a   : > { %p714_p4 = pnand %p713_p1, %p557_p5  ;;  %p721_p6 = por %p720_p12, %p719_p11 }
 0x20c   : > { %p715_p7 = pneg %p714_p4 }
 0x20e   : > { %p722_p8 = pnand %p721_p6, %p715_p7 }
 0x210   : > { %725 = shalt.err (!%p722_p8)
}
 0x211   : > { %s726_s21 = scalar_lea.hbm %s1055_s3, 128 }
 0x212   : > { %p727_p10 = scmp.ne.s32.totalorder %s1055_s3, %s726_s21  ;;  %p732_p3 = scmp.lt.u32.totalorder %s726_s21, %s1055_s3 }
 0x214   : > { %p728_p13 = pnand %p727_p10, %p557_p5 }
 0x216   : > { %p729_p2 = pneg %p728_p13 }
 0x218   : > { %p734_p9 = pnand %p732_p3, %p729_p2 }
 0x21a   : > { %737 = shalt.err (!%p734_p9)
}
 0x21b   : > { %540 = dma.vmem_to_hbm [thread:$0]  (%p557_p5), %s406_s11, 128, %s1055_s3, [#allocation7]  }
 0x21c   : > { %771 = dma.done.wait (%p557_p5), [#allocation7], 128  }
 0x21d   : > { %773 = vsyncadd (%p557_p5), [#allocation7], 4294967168 }
 0x21e PF: > { %s18_s17 = sadd.s32 1, %s796_s17   ;;  %s1073_s12 = smov %s780_s13 }
 0x21f   : > { %p15_p0 = scmp.ge.s32.totalorder %s18_s17, 6   ;;  %s1074_s13 = smov %s784_s14 }
 0x220   : > { %s1075_s14 = smov %s873_s24  ;;  %s1076_s15 = smov %s792_s16 }
 0x221   : > { %s1077_s16 = smov %s1079_s18  ;;  %17 = sbr.rel (!%p15_p0) target bundleno = 6 (0x6), region = 95 }
 0x228   :  { %418 = vsyncpa [#allocation6], 1 }
 0x229   :  { %420 = vsyncpa [#allocation6 + $0x1], 1 }
 0x22a   :  { %421 = vsyncpa [#allocation9], 1 }
 0x22b   :  { %423 = vsyncpa [#allocation9 + $0x1], 1 }
 0x22c   :  { %424 = vsyncpa [#allocation7], 1 }
 0x22d   :  { %426 = vsyncpa [#allocation7 + $0x1], 1 }

</bundles_post_ra>
